<compile_context>
chip_gen: v7x
topology: tpu7x:2x2x1
jax: 0.10.0
libtpu: 0.0.40
codegen_flags: <defaults>
</compile_context>

<pallas_src>
import functools
import math

import jax
import jax.numpy as jnp
from jax.experimental import pallas as pl
from jax.experimental.pallas import tpu as pltpu

ALPHA = 0.1
LAMBDA = 0.5
N_LAYERS = 3
LANE = 128


def _round_up(v, m):
    return (v + m - 1) // m * m


def _pad2(a, rows, cols, dtype):
    a = jnp.asarray(a)
    out = jnp.pad(a, ((0, rows - a.shape[0]), (0, cols - a.shape[1])))
    return out.astype(dtype)


def _vmem_limit_bytes():
    """Per-chip VMEM limit with headroom (48 MiB on v7x, ~96 MiB on v5e/v6e)."""
    cap = 64 * 1024 * 1024  # conservative default: v7x physical VMEM
    try:
        info = pltpu.get_tpu_info()
        cap_attr = getattr(info, "vmem_capacity_bytes", None)
        if cap_attr:
            cap = int(cap_attr)
    except Exception:
        pass
    return min((cap * 3) // 4, 100 * 1024 * 1024)


def _pick_tile(n, tile):
    """Row/K tile: multiple of 128, minimal row padding, prefer an even number
    of row tiles (shards the 'parallel' axis across v7x's 2 TensorCores)."""
    base = _round_up(max(n, 1), LANE)
    t_max = min(_round_up(max(tile, LANE), LANE), base)
    best = None
    for t in range(t_max, LANE - 1, -LANE):
        n_pad = _round_up(n, t)
        n_tiles = n_pad // t
        key = (n_pad, 0 if (n_tiles % 2 == 0 and n_tiles >= 2) else 1, -t)
        if best is None or key < best[0]:
            best = (key, t)
    return best[1]


# ----------------------------------------------------------------------------
# Kernel 1: input projection  x0 = relu(x @ W0 + b0)
# ----------------------------------------------------------------------------
def _linear_relu_kernel(x_ref, w_ref, b_ref, o_ref):
    y = jnp.dot(x_ref[...], w_ref[...], preferred_element_type=jnp.float32)
    y = jnp.maximum(y + b_ref[...], 0.0)
    o_ref[...] = y.astype(o_ref.dtype)


def _input_projection(x_p, w0, b0, *, tm, vmem_limit):
    n_pad, f_pad = x_p.shape
    h_pad = w0.shape[1]
    flops = 2 * n_pad * f_pad * h_pad
    bytes_accessed = int(x_p.size * 2 + w0.size * 2 + b0.size * 4
                         + n_pad * h_pad * 2)
    return pl.pallas_call(
        _linear_relu_kernel,
        out_shape=jax.ShapeDtypeStruct((n_pad, h_pad), jnp.bfloat16),
        grid=(n_pad // tm,),
        in_specs=[
            pl.BlockSpec((tm, f_pad), lambda i: (i, 0)),
            pl.BlockSpec((f_pad, h_pad), lambda i: (0, 0)),
            pl.BlockSpec((1, h_pad), lambda i: (0, 0)),
        ],
        out_specs=pl.BlockSpec((tm, h_pad), lambda i: (i, 0)),
        compiler_params=pltpu.CompilerParams(
            dimension_semantics=("parallel",),
            vmem_limit_bytes=vmem_limit,
        ),
        cost_estimate=pl.CostEstimate(
            flops=flops, transcendentals=0, bytes_accessed=bytes_accessed),
    )(x_p, w0, b0)


# ----------------------------------------------------------------------------
# Kernel 2 (streamed path): one GCN2Conv layer, row-tiled over A_hat with a
# K reduction axis.
# ----------------------------------------------------------------------------
def _gcn2_layer_kernel(a_ref, x_ref, x0_ref, w_ref, b_ref, o_ref, acc_ref,
                       *, beta, apply_relu):
    k = pl.program_id(1)

    part = jnp.dot(a_ref[...], x_ref[...], preferred_element_type=jnp.float32)

    @pl.when(k == 0)
    def _():
        acc_ref[...] = part            # skip the zero-fill + first RMW

    @pl.when(k > 0)
    def _():
        acc_ref[...] += part

    # epilogue only once per output tile, at the last K step
    @pl.when(k == pl.num_programs(1) - 1)
    def _():
        h = acc_ref[...]
        s = (1.0 - ALPHA) * h + ALPHA * x0_ref[...].astype(jnp.float32)
        sw = jnp.dot(s.astype(jnp.bfloat16), w_ref[...],
                     preferred_element_type=jnp.float32)
        y = (1.0 - beta) * s + beta * sw + b_ref[...]
        if apply_relu:
            y = jnp.maximum(y, 0.0)
        o_ref[...] = y.astype(o_ref.dtype)


def _gcn2_layer_call(a_p, x_p, x0_p, w, b, *, beta, apply_relu, tm, tk,
                     vmem_limit):
    n_pad = a_p.shape[0]
    h_pad = w.shape[1]
    n_row = n_pad // tm
    kernel = functools.partial(_gcn2_layer_kernel, beta=beta,
                               apply_relu=apply_relu)
    flops = 2 * n_pad * n_pad * h_pad + 2 * n_pad * h_pad * h_pad
    bytes_accessed = int(
        n_pad * n_pad * 2                 # A_hat stream (bf16)
        + n_row * n_pad * h_pad * 2       # x K-slabs re-streamed per row tile
        + n_pad * h_pad * 2               # x0 row slabs
        + w.size * 2 + b.size * 4
        + n_pad * h_pad * 2)              # output (bf16)
    return pl.pallas_call(
        kernel,
        out_shape=jax.ShapeDtypeStruct((n_pad, h_pad), jnp.bfloat16),
        grid=(n_row, n_pad // tk),
        in_specs=[
            pl.BlockSpec((tm, tk), lambda i, k: (i, k)),        # A_hat tile
            pl.BlockSpec((tk, h_pad), lambda i, k: (k, 0)),     # x K-slab
            pl.BlockSpec((tm, h_pad), lambda i, k: (i, 0)),     # x0 row-slab
            pl.BlockSpec((h_pad, h_pad), lambda i, k: (0, 0)),  # W (resident)
            pl.BlockSpec((1, h_pad), lambda i, k: (0, 0)),      # bias
        ],
        out_specs=pl.BlockSpec((tm, h_pad), lambda i, k: (i, 0)),
        scratch_shapes=[pltpu.VMEM((tm, h_pad), jnp.float32)],
        compiler_params=pltpu.CompilerParams(
            dimension_semantics=("parallel", "arbitrary"),
            vmem_limit_bytes=vmem_limit,
        ),
        cost_estimate=pl.CostEstimate(
            flops=flops, transcendentals=0, bytes_accessed=bytes_accessed),
    )(a_p, x_p, x0_p, w, b)


# ----------------------------------------------------------------------------
# Kernel 3 (streamed path): last GCN2Conv layer fused with the output Linear.
# ----------------------------------------------------------------------------
def _gcn2_last_kernel(a_ref, x_ref, x0_ref, w_ref, b_ref, wo_ref, bo_ref,
                      o_ref, acc_ref, *, beta):
    k = pl.program_id(1)

    part = jnp.dot(a_ref[...], x_ref[...], preferred_element_type=jnp.float32)

    @pl.when(k == 0)
    def _():
        acc_ref[...] = part

    @pl.when(k > 0)
    def _():
        acc_ref[...] += part

    @pl.when(k == pl.num_programs(1) - 1)
    def _():
        h = acc_ref[...]
        s = (1.0 - ALPHA) * h + ALPHA * x0_ref[...].astype(jnp.float32)
        sw = jnp.dot(s.astype(jnp.bfloat16), w_ref[...],
                     preferred_element_type=jnp.float32)
        y = (1.0 - beta) * s + beta * sw + b_ref[...]
        out = jnp.dot(y.astype(jnp.bfloat16), wo_ref[...],
                      preferred_element_type=jnp.float32)
        o_ref[...] = out + bo_ref[...]


def _gcn2_last_call(a_p, x_p, x0_p, w, b, wo, bo, *, beta, tm, tk, vmem_limit):
    n_pad = a_p.shape[0]
    h_pad = w.shape[1]
    c_pad = wo.shape[1]
    n_row = n_pad // tm
    kernel = functools.partial(_gcn2_last_kernel, beta=beta)
    flops = (2 * n_pad * n_pad * h_pad + 2 * n_pad * h_pad * h_pad
             + 2 * n_pad * h_pad * c_pad)
    bytes_accessed = int(
        n_pad * n_pad * 2
        + n_row * n_pad * h_pad * 2
        + n_pad * h_pad * 2
        + (w.size + wo.size) * 2 + (b.size + bo.size) * 4
        + n_pad * c_pad * 4)
    return pl.pallas_call(
        kernel,
        out_shape=jax.ShapeDtypeStruct((n_pad, c_pad), jnp.float32),
        grid=(n_row, n_pad // tk),
        in_specs=[
            pl.BlockSpec((tm, tk), lambda i, k: (i, k)),
            pl.BlockSpec((tk, h_pad), lambda i, k: (k, 0)),
            pl.BlockSpec((tm, h_pad), lambda i, k: (i, 0)),
            pl.BlockSpec((h_pad, h_pad), lambda i, k: (0, 0)),
            pl.BlockSpec((1, h_pad), lambda i, k: (0, 0)),
            pl.BlockSpec((h_pad, c_pad), lambda i, k: (0, 0)),
            pl.BlockSpec((1, c_pad), lambda i, k: (0, 0)),
        ],
        out_specs=pl.BlockSpec((tm, c_pad), lambda i, k: (i, 0)),
        scratch_shapes=[pltpu.VMEM((tm, h_pad), jnp.float32)],
        compiler_params=pltpu.CompilerParams(
            dimension_semantics=("parallel", "arbitrary"),
            vmem_limit_bytes=vmem_limit,
        ),
        cost_estimate=pl.CostEstimate(
            flops=flops, transcendentals=0, bytes_accessed=bytes_accessed),
    )(a_p, x_p, x0_p, w, b, wo, bo)


# ----------------------------------------------------------------------------
# Kernel 4 (fused path): all 3 GCN2Conv layers + output Linear in one call,
# with A_hat DMA'd once into VMEM and kept resident across layers.
# Grid = (layer, row_tile); layer is outermost so every row of x_l is written
# before layer l+1 reads it.
# ----------------------------------------------------------------------------
def _gcn2_fused_kernel(a_hbm, x0_ref,
                       w1_ref, b1_ref, w2_ref, b2_ref, w3_ref, b3_ref,
                       wo_ref, bo_ref, o_ref,
                       a_vmem, xb1, xb2, *, betas, tm):
    l = pl.program_id(0)
    i = pl.program_id(1)

    @pl.when((l == 0) & (i == 0))
    def _():
        # One-time HBM -> VMEM copy of A_hat (read once for all 3 layers).
        pltpu.sync_copy(a_hbm, a_vmem)

    row = pl.multiple_of(i * tm, tm)
    a_rows = a_vmem[pl.ds(row, tm), :]                        # (tm, n_pad) bf16
    x0_rows = x0_ref[pl.ds(row, tm), :].astype(jnp.float32)   # (tm, h_pad) f32

    @pl.when(l == 0)
    def _():
        h = jnp.dot(a_rows, x0_ref[...], preferred_element_type=jnp.float32)
        s = (1.0 - ALPHA) * h + ALPHA * x0_rows
        sw = jnp.dot(s.astype(jnp.bfloat16), w1_ref[...],
                     preferred_element_type=jnp.float32)
        y = (1.0 - betas[0]) * s + betas[0] * sw + b1_ref[...]
        xb1[pl.ds(row, tm), :] = jnp.maximum(y, 0.0).astype(jnp.bfloat16)

    @pl.when(l == 1)
    def _():
        h = jnp.dot(a_rows, xb1[...], preferred_element_type=jnp.float32)
        s = (1.0 - ALPHA) * h + ALPHA * x0_rows
        sw = jnp.dot(s.astype(jnp.bfloat16), w2_ref[...],
                     preferred_element_type=jnp.float32)
        y = (1.0 - betas[1]) * s + betas[1] * sw + b2_ref[...]
        xb2[pl.ds(row, tm), :] = jnp.maximum(y, 0.0).astype(jnp.bfloat16)

    @pl.when(l == 2)
    def _():
        h = jnp.dot(a_rows, xb2[...], preferred_element_type=jnp.float32)
        s = (1.0 - ALPHA) * h + ALPHA * x0_rows
        sw = jnp.dot(s.astype(jnp.bfloat16), w3_ref[...],
                     preferred_element_type=jnp.float32)
        y = (1.0 - betas[2]) * s + betas[2] * sw + b3_ref[...]
        out = jnp.dot(y.astype(jnp.bfloat16), wo_ref[...],
                      preferred_element_type=jnp.float32) + bo_ref[...]
        o_ref[...] = out


def _fused_vmem_bytes(n_pad, h_pad, c_pad, tm):
    a_bytes = n_pad * n_pad * 2                       # A resident (bf16)
    act_bytes = 2 * n_pad * h_pad * 2                 # 2 activation scratches
    x0_bytes = 2 * n_pad * h_pad * 2                  # x0 (double-buffered)
    w_bytes = 2 * (3 * h_pad * h_pad + h_pad * c_pad) * 2
    bias_bytes = 2 * (3 * h_pad + c_pad) * 4
    out_bytes = 2 * tm * c_pad * 4
    tmp_bytes = tm * n_pad * 2 + 4 * tm * h_pad * 4   # A row slice + f32 temps
    return (a_bytes + act_bytes + x0_bytes + w_bytes + bias_bytes
            + out_bytes + tmp_bytes)


def _gcn2_fused_call(a_p, x0, ws, bs, wo, bo, *, betas, tm, vmem_limit):
    n_pad = a_p.shape[0]
    h_pad = ws[0].shape[1]
    c_pad = wo.shape[1]
    n_row = n_pad // tm
    kernel = functools.partial(_gcn2_fused_kernel, betas=tuple(betas), tm=tm)
    flops = (N_LAYERS * (2 * n_pad * n_pad * h_pad + 2 * n_pad * h_pad * h_pad)
             + 2 * n_pad * h_pad * c_pad)
    bytes_accessed = int(a_p.size * 2 + x0.size * 2
                         + sum(int(w.size) for w in ws) * 2 + wo.size * 2
                         + sum(int(b.size) for b in bs) * 4 + bo.size * 4
                         + n_pad * c_pad * 4)
    return pl.pallas_call(
        kernel,
        out_shape=jax.ShapeDtypeStruct((n_pad, c_pad), jnp.float32),
        grid=(N_LAYERS, n_row),
        in_specs=[
            pl.BlockSpec(memory_space=pl.ANY),                    # A_hat (HBM)
            pl.BlockSpec((n_pad, h_pad), lambda l, i: (0, 0)),    # x0 resident
            pl.BlockSpec((h_pad, h_pad), lambda l, i: (0, 0)),    # W1
            pl.BlockSpec((1, h_pad), lambda l, i: (0, 0)),        # b1
            pl.BlockSpec((h_pad, h_pad), lambda l, i: (0, 0)),    # W2
            pl.BlockSpec((1, h_pad), lambda l, i: (0, 0)),        # b2
            pl.BlockSpec((h_pad, h_pad), lambda l, i: (0, 0)),    # W3
            pl.BlockSpec((1, h_pad), lambda l, i: (0, 0)),        # b3
            pl.BlockSpec((h_pad, c_pad), lambda l, i: (0, 0)),    # Wo
            pl.BlockSpec((1, c_pad), lambda l, i: (0, 0)),        # bo
        ],
        out_specs=pl.BlockSpec((tm, c_pad), lambda l, i: (i, 0)),
        scratch_shapes=[
            pltpu.VMEM((n_pad, n_pad), jnp.bfloat16),   # A resident
            pltpu.VMEM((n_pad, h_pad), jnp.bfloat16),   # layer-1 activations
            pltpu.VMEM((n_pad, h_pad), jnp.bfloat16),   # layer-2 activations
        ],
        compiler_params=pltpu.CompilerParams(
            dimension_semantics=("arbitrary", "arbitrary"),
            vmem_limit_bytes=vmem_limit,
        ),
        cost_estimate=pl.CostEstimate(
            flops=flops, transcendentals=0, bytes_accessed=bytes_accessed),
    )(a_p, x0, ws[0], bs[0], ws[1], bs[1], ws[2], bs[2], wo, bo)


# ----------------------------------------------------------------------------
# Wrapper: pad to lane-dense / MXU-native shapes, run the pipeline, un-pad.
# ----------------------------------------------------------------------------
def gcn2_forward(a_hat, x, params, *, tile=512, force_streamed=False):
    """GCNII forward. a_hat: [N,N] pre-normalized dense adjacency, x: [N,F]."""
    n, f = x.shape
    h = params["w0"].shape[1]
    c = params["wo"].shape[1]

    vmem_limit = _vmem_limit_bytes()
    tm = _pick_tile(n, tile)
    tk = tm
    n_pad = _round_up(n, tm)
    f_pad = _round_up(f, LANE)
    h_pad = _round_up(h, LANE)
    c_pad = _round_up(c, LANE)

    # bf16 adjacency / features / weights; f32 accumulation inside the kernels.
    # TODO(synk): on v7x, A_hat could additionally be stored as fp8 (e4m3) to
    # halve the dominant HBM stream; kept bf16 here for accuracy on all chips.
    a_p = _pad2(a_hat, n_pad, n_pad, jnp.bfloat16)
    x_p = _pad2(x, n_pad, f_pad, jnp.bfloat16)
    w0 = _pad2(params["w0"], f_pad, h_pad, jnp.bfloat16)
    b0 = _pad2(params["b0"], 1, h_pad, jnp.float32)
    ws = [_pad2(params[f"w{l}"], h_pad, h_pad, jnp.bfloat16) for l in (1, 2, 3)]
    bs = [_pad2(params[f"b{l}"], 1, h_pad, jnp.float32) for l in (1, 2, 3)]
    wo = _pad2(params["wo"], h_pad, c_pad, jnp.bfloat16)
    bo = _pad2(params["bo"], 1, c_pad, jnp.float32)

    betas = [math.log(LAMBDA / float(l + 1) + 1.0) for l in range(N_LAYERS)]

    # dropout=0.0 in the module -> all F.dropout calls are identity.
    x0 = _input_projection(x_p, w0, b0, tm=tm, vmem_limit=vmem_limit)

    use_fused = (not force_streamed
                 and _fused_vmem_bytes(n_pad, h_pad, c_pad, tm)
                 <= int(0.8 * vmem_limit))
    if use_fused:
        out = _gcn2_fused_call(a_p, x0, ws, bs, wo, bo, betas=betas, tm=tm,
                               vmem_limit=vmem_limit)
    else:
        xc = x0
        for l in range(N_LAYERS - 1):
            xc = _gcn2_layer_call(a_p, xc, x0, ws[l], bs[l], beta=betas[l],
                                  apply_relu=True, tm=tm, tk=tk,
                                  vmem_limit=vmem_limit)
        out = _gcn2_last_call(a_p, xc, x0, ws[-1], bs[-1], wo, bo,
                              beta=betas[-1], tm=tm, tk=tk,
                              vmem_limit=vmem_limit)
    return out[:n, :c]


def gcn2_reference(a_hat, x, params):
    """Plain-JAX f32 reference of the same forward for verification."""
    betas = [math.log(LAMBDA / float(l + 1) + 1.0) for l in range(N_LAYERS)]
    x0 = jnp.maximum(x @ params["w0"] + params["b0"], 0.0)
    hcur = x0
    ws = (params["w1"], params["w2"], params["w3"])
    bs = (params["b1"], params["b2"], params["b3"])
    for l in range(N_LAYERS):
        p = a_hat @ hcur
        s = (1.0 - ALPHA) * p + ALPHA * x0
        hcur = (1.0 - betas[l]) * s + betas[l] * (s @ ws[l]) + bs[l]
        if l != N_LAYERS - 1:
            hcur = jnp.maximum(hcur, 0.0)
    return hcur @ params["wo"] + params["bo"]


def make_params(key, in_feats, n_hidden, n_classes):
    """Deterministic synthetic parameters (matches module's shapes)."""
    ks = jax.random.split(key, 10)
    scale_in = 1.0 / math.sqrt(in_feats)
    scale_h = 1.0 / math.sqrt(n_hidden)
    return {
        # nn.Linear(in_feats, n_hidden): stored pre-transposed as [in, hidden]
        "w0": jax.random.uniform(ks[0], (in_feats, n_hidden), jnp.float32,
                                 -scale_in, scale_in),
        "b0": jax.random.uniform(ks[1], (1, n_hidden), jnp.float32,
                                 -scale_in, scale_in),
        # GCN2Conv weights: [n_hidden, n_hidden] + bias [1, n_hidden]
        "w1": jax.random.uniform(ks[2], (n_hidden, n_hidden), jnp.float32,
                                 -scale_h, scale_h),
        "b1": jnp.zeros((1, n_hidden), jnp.float32),
        "w2": jax.random.uniform(ks[3], (n_hidden, n_hidden), jnp.float32,
                                 -scale_h, scale_h),
        "b2": jnp.zeros((1, n_hidden), jnp.float32),
        "w3": jax.random.uniform(ks[4], (n_hidden, n_hidden), jnp.float32,
                                 -scale_h, scale_h),
        "b3": jnp.zeros((1, n_hidden), jnp.float32),
        # nn.Linear(n_hidden, n_classes): stored pre-transposed
        "wo": jax.random.uniform(ks[5], (n_hidden, n_classes), jnp.float32,
                                 -scale_h, scale_h),
        "bo": jax.random.uniform(ks[6], (1, n_classes), jnp.float32,
                                 -scale_h, scale_h),
    }


def make_graph(key, n_nodes):
    """Deterministic random symmetric graph -> normalized dense adjacency."""
    a = (jax.random.uniform(key, (n_nodes, n_nodes)) < 0.3).astype(jnp.float32)
    a = jnp.maximum(a, a.T)                                   # symmetric
    a = jnp.maximum(a, jnp.eye(n_nodes, dtype=jnp.float32))   # self loops
    deg = jnp.maximum(jnp.sum(a, axis=1), 1.0)
    d_inv_sqrt = 1.0 / jnp.sqrt(deg)
    return a * d_inv_sqrt[:, None] * d_inv_sqrt[None, :]


if __name__ == "__main__":
    key = jax.random.PRNGKey(0)
    k_case1, k_case2 = jax.random.split(key)

    def run_case(case_key, n, in_feats, n_hidden, n_classes, *, tile,
                 force_streamed):
        kg, kx, kp = jax.random.split(case_key, 3)
        a_hat = make_graph(kg, n)
        x = jax.random.normal(kx, (n, in_feats), dtype=jnp.float32)
        params = make_params(kp, in_feats, n_hidden, n_classes)
        out = jax.block_until_ready(
            gcn2_forward(a_hat, x, params, tile=tile,
                         force_streamed=force_streamed))
        ref = gcn2_reference(a_hat, x, params)
        assert out.shape == (n, n_classes)
        rel_err = float(jnp.max(jnp.abs(out - ref))
                        / (jnp.max(jnp.abs(ref)) + 1e-6))
        assert rel_err < 5e-2, (
            f"mismatch vs JAX reference (n={n}, streamed={force_streamed}): "
            f"rel_err={rel_err:.4f}")

    # Case 1: tiny module-consistent shapes -> A-resident fused path.
    run_case(k_case1, 32, 16, 32, 8, tile=512, force_streamed=False)
    # Case 2: multi-row-tile / multi-K streamed path (3x3 grid) exercising the
    # k==0 init, accumulation, and last-K epilogue gating.
    run_case(k_case2, 384, 64, 64, 8, tile=128, force_streamed=True)
    # Case 2 again on the fused path (multi row tile, A resident).
    run_case(k_case2, 384, 64, 64, 8, tile=128, force_streamed=False)

    print("KERNEL_OK")
</pallas_src>

<mosaic_0001>
module attributes {stable_mosaic.version = 11 : i64} {
  func.func @_linear_relu_kernel(%arg0: i32, %arg1: memref<128x128xbf16, #tpu.memory_space<vmem>>, %arg2: memref<128x128xbf16, #tpu.memory_space<vmem>>, %arg3: memref<1x128xf32, #tpu.memory_space<vmem>>, %arg4: memref<128x128xbf16, #tpu.memory_space<vmem>>) attributes {dimension_semantics = [#tpu.dimension_semantics<parallel>], iteration_bounds = array<i64: 1>, scalar_prefetch = 0 : i64, scratch_operands = 0 : i64, tpu.core_type = #tpu.core_type<tc>, window_params = [{transform_indices = @transform_0, window_bounds = array<i64: 128, 128>}, {pipeline_mode = #tpu.pipeline_mode<synchronous>, transform_indices = @transform_1, window_bounds = array<i64: 128, 128>}, {pipeline_mode = #tpu.pipeline_mode<synchronous>, transform_indices = @transform_2, window_bounds = array<i64: 1, 128>}, {transform_indices = @transform_3, window_bounds = array<i64: 128, 128>}]} {
    %c0 = arith.constant 0 : index
    %c0_0 = arith.constant 0 : index
    %0 = vector.load %arg1[%c0, %c0_0] : memref<128x128xbf16, #tpu.memory_space<vmem>>, vector<128x128xbf16>
    %c0_1 = arith.constant 0 : index
    %c0_2 = arith.constant 0 : index
    %1 = vector.load %arg2[%c0_1, %c0_2] : memref<128x128xbf16, #tpu.memory_space<vmem>>, vector<128x128xbf16>
    %cst = arith.constant dense<0.000000e+00> : vector<128x128xf32>
    %2 = tpu.matmul %0, %1, %cst {dimension_numbers = #tpu.dot_dimension_numbers<[1], [0], [0], [1], [0, 0, 1, 1], [], []>} : vector<128x128xbf16>, vector<128x128xbf16>, vector<128x128xf32> -> vector<128x128xf32>
    %c0_3 = arith.constant 0 : index
    %c0_4 = arith.constant 0 : index
    %3 = vector.load %arg3[%c0_3, %c0_4] : memref<1x128xf32, #tpu.memory_space<vmem>>, vector<1x128xf32>
    %4 = vector.broadcast %3 : vector<1x128xf32> to vector<128x128xf32>
    %5 = arith.addf %2, %4 : vector<128x128xf32>
    %cst_5 = arith.constant 0.000000e+00 : f32
    %6 = vector.broadcast %cst_5 : f32 to vector<128x128xf32>
    %7 = arith.maximumf %5, %6 : vector<128x128xf32>
    %8 = arith.truncf %7 : vector<128x128xf32> to vector<128x128xbf16>
    %c0_6 = arith.constant 0 : index
    %c0_7 = arith.constant 0 : index
    %9 = vector.load %arg4[%c0_6, %c0_7] : memref<128x128xbf16, #tpu.memory_space<vmem>>, vector<128x128xbf16>
    tpu.vector_store %arg4[%c0_6, %c0_7], %8 {strides = array<i32>} : memref<128x128xbf16, #tpu.memory_space<vmem>>, vector<128x128xbf16>,
    return
  }
  func.func @transform_0(%arg0: i32) -> (i32, i32) {
    %c0_i32 = arith.constant 0 : i32
    %c0_i32_0 = arith.constant 0 : i32
    return %arg0, %c0_i32 : i32, i32
  }
  func.func @transform_1(%arg0: i32) -> (i32, i32) {
    %c0_i32 = arith.constant 0 : i32
    %c0_i32_0 = arith.constant 0 : i32
    %c0_i32_1 = arith.constant 0 : i32
    return %c0_i32, %c0_i32_0 : i32, i32
  }
  func.func @transform_2(%arg0: i32) -> (i32, i32) {
    %c0_i32 = arith.constant 0 : i32
    %c0_i32_0 = arith.constant 0 : i32
    %c0_i32_1 = arith.constant 0 : i32
    return %c0_i32, %c0_i32_0 : i32, i32
  }
  func.func @transform_3(%arg0: i32) -> (i32, i32) {
    %c0_i32 = arith.constant 0 : i32
    %c0_i32_0 = arith.constant 0 : i32
    return %arg0, %c0_i32 : i32, i32
  }
}

</mosaic_0001>

<bundles_post_ra>
// kernel: tpu_custom_call.1
= control target key start
LH: loop header
LB: loop body
LE: loop exit
PB: predicated region body
PF: predicated region fallthrough
CT: control target
= control target key end

     0   :  { %8 = vsyncpa [#allocation3], 0  ;;  %s716_s0 = inlined_call_operand.hbm [shape: bf16[128,128], index: 0, kind: input, shape index: {}]   ;;  %s717_s1 = inlined_call_operand.hbm [shape: bf16[128,128], index: 1, kind: input, shape index: {}]   ;;  %s718_s2 = inlined_call_operand.vmem [shape: f32[1,128], index: 2, kind: input, shape index: {}]   ;;  %s719_s3 = inlined_call_operand.hbm [shape: bf16[128,128], index: 3, kind: output, shape index: {}]  }
   0x1   :  { %9 = vsyncpa [#allocation6], 0 }
   0x2   :  { %10 = vsyncpa [#allocation4], 0  ;;  %s643_s12 = smov [#allocation2]   ;;  %s571_s16 = scalar_lea.hbm %s716_s0, 1024 }
   0x3   :  { %s16_s13 = sshll.u32 %s643_s12, 4  ;;  %p572_p0 = scmp.ne.s32.totalorder %s716_s0, %s571_s16  ;;  %s17_s13 = int_to_ptr.vmem [resolvable:$true] %s16_s13 }
   0x4   :  { %p575_p1 = scmp.lt.u32.totalorder %s571_s16, %s716_s0 }
   0x6   :  { %p577_p2 = pnand %p575_p1, %p572_p0 }
   0x8   :  { %580 = shalt.err (!%p577_p2)
}
   0x9   :  { %s581_s21 = scalar_lea.vmem %s17_s13, 1024  ;;  %p586_p4 = scmp.lt.s32.totalorder %s17_s13, %s17_s13 }
   0xa   :  { %p582_p3 = scmp.ne.s32.totalorder %s17_s13, %s581_s21  ;;  %p587_p5 = scmp.lt.s32.totalorder %s581_s21, %s581_s21 }
   0xc   :  { %p588_p6 = por %p587_p5, %p586_p4 }
   0xe   :  { %p589_p7 = pnand %p588_p6, %p582_p3 }
  0x10   :  { %592 = shalt.err (!%p589_p7)
}
  0x11   :  { %s644_s22 = smov 64   ;;  %s645_s23 = smov 4  }
  0x12   :  { %22 = dma.hbm_to_vmem [thread:$0]  %s716_s0, 1024, %s17_s13, [#allocation3], %s644_s22, %s644_s22, %s645_s23  }
  0x13   :  { %s646_s26 = smov [#allocation5]   ;;  %s593_s30 = scalar_lea.hbm %s717_s1, 1024 }
  0x14   :  { %s28_s27 = sshll.u32 %s646_s26, 4  ;;  %p594_p8 = scmp.ne.s32.totalorder %s717_s1, %s593_s30  ;;  %s29_s27 = int_to_ptr.vmem [resolvable:$true] %s28_s27 }
  0x15   :  { %p597_p9 = scmp.lt.u32.totalorder %s593_s30, %s717_s1 }
  0x17   :  { %p599_p10 = pnand %p597_p9, %p594_p8 }
  0x19   :  { %602 = shalt.err (!%p599_p10)
}
  0x1a   :  { %s603_s8 = scalar_lea.vmem %s29_s27, 1024  ;;  %p608_p12 = scmp.lt.s32.totalorder %s29_s27, %s29_s27 }
  0x1b   :  { %p604_p11 = scmp.ne.s32.totalorder %s29_s27, %s603_s8  ;;  %p609_p13 = scmp.lt.s32.totalorder %s603_s8, %s603_s8 }
  0x1d   :  { %p610_p0 = por %p609_p13, %p608_p12 }
  0x1f   :  { %p611_p1 = pnand %p610_p0, %p604_p11 }
  0x21   :  { %614 = shalt.err (!%p611_p1)
}
  0x22   :  { %34 = dma.hbm_to_vmem [thread:$0]  %s717_s1, 1024, %s29_s27, [#allocation6], %s644_s22, %s644_s22, %s645_s23  }
  0x23   :  { %637 = dma.done.wait [#allocation3], 1024  }
  0x24   :  { %638 = vsyncadd [#allocation3], 4294966272 }
  0x25   :  { %639 = dma.done.wait [#allocation6], 1024  }
  0x26   :  { %640 = vsyncadd [#allocation6], 4294966272  ;;  %v555_v0 = vld [vmem:[#allocation5] sm:$0xff]   ;;  %v556_v1 = vld [vmem:[#allocation5 + $0x8] sm:$0xff]  }
  0x27   :  { %502 = vmatprep.subr.bf16.mxu0 %v555_v0  ;;  %534 = vmatprep.subr.bf16.mxu1 %v555_v0  ;;  %v557_v2 = vld [vmem:[#allocation5 + $0x10] sm:$0xff]   ;;  %v558_v3 = vld [vmem:[#allocation5 + $0x18] sm:$0xff]   ;;  %v563_v4 = vld [vmem:[#allocation2] sm:$0xff]  }
  0x28   :  { %503 = vmatpush3.bf16.msra.mxu0 %v555_v0  ;;  %542 = vmatpush3.bf16.msra.mxu1 %v555_v0  ;;  %v564_v5 = vld [vmem:[#allocation2 + $0x20] sm:$0xff]   ;;  %v560_v7 = vld [vmem:[#allocation5 + $0x28] sm:$0xff]   ;;  %v561_v8 = vld [vmem:[#allocation5 + $0x30] sm:$0xff]  }
  0x29   :  { %504 = vmatprep.subr.bf16.mxu0 %v556_v1  ;;  %535 = vmatprep.subr.bf16.mxu1 %v556_v1  ;;  %v559_v6 = vld [vmem:[#allocation5 + $0x20] sm:$0xff]   ;;  %v562_v9 = vld [vmem:[#allocation5 + $0x38] sm:$0xff]   ;;  %v565_v10 = vld [vmem:[#allocation2 + $0x8] sm:$0xff]  }
  0x2a   :  { %518 = vmatprep.mubr.bf16.mxu0 %v563_v4  ;;  %526 = vmatprep.mubr.bf16.mxu1 %v564_v5  ;;  %v566_v11 = vld [vmem:[#allocation2 + $0x28] sm:$0xff]   ;;  %v567_v12 = vld [vmem:[#allocation2 + $0x10] sm:$0xff]   ;;  %v569_v14 = vld [vmem:[#allocation2 + $0x18] sm:$0xff]  }
  0x2b   :  { %v568_v13 = vld [vmem:[#allocation2 + $0x30] sm:$0xff]   ;;  %v570_v15 = vld [vmem:[#allocation2 + $0x38] sm:$0xff]   ;;  %v390_v16 = vld [vmem:[%s718_s2] ss:$0 sm:$0xff]  ;;  %s647_s2 = smov [#allocation7]  }
  0x2c   :  { %505 = vmatpush3.bf16.msra.mxu0 %v556_v1  ;;  %543 = vmatpush3.bf16.msra.mxu1 %v556_v1  ;;  %s377_s11 = sshll.u32 %s647_s2, 4  ;;  %s378_s11 = int_to_ptr.vmem [resolvable:$true] %s377_s11 }
  0x2d   :  { %506 = vmatprep.subr.bf16.mxu0 %v557_v2  ;;  %536 = vmatprep.subr.bf16.mxu1 %v557_v2  ;;  %s615_s12 = scalar_lea.vmem %s378_s11, 1024  ;;  %p620_p3 = scmp.lt.s32.totalorder %s378_s11, %s378_s11 }
  0x2e   :  { %p616_p2 = scmp.ne.s32.totalorder %s378_s11, %s615_s12  ;;  %p621_p4 = scmp.lt.s32.totalorder %s615_s12, %s615_s12 }
  0x30   :  { %507 = vmatpush3.bf16.msra.mxu0 %v557_v2  ;;  %544 = vmatpush3.bf16.msra.mxu1 %v557_v2  ;;  %p622_p5 = por %p621_p4, %p620_p3 }
  0x31   :  { %508 = vmatprep.subr.bf16.mxu0 %v558_v3  ;;  %537 = vmatprep.subr.bf16.mxu1 %v558_v3 }
  0x32   :  { %p623_p6 = pnand %p622_p5, %p616_p2 }
  0x34   :  { %509 = vmatpush3.bf16.msra.mxu0 %v558_v3  ;;  %545 = vmatpush3.bf16.msra.mxu1 %v558_v3 }
  0x35   :  { %510 = vmatprep.subr.bf16.mxu0 %v559_v6  ;;  %538 = vmatprep.subr.bf16.mxu1 %v559_v6 }
  0x38   :  { %511 = vmatpush3.bf16.msra.mxu0 %v559_v6  ;;  %546 = vmatpush3.bf16.msra.mxu1 %v559_v6 }
  0x39   :  { %512 = vmatprep.subr.bf16.mxu0 %v560_v7  ;;  %539 = vmatprep.subr.bf16.mxu1 %v560_v7 }
  0x3c   :  { %513 = vmatpush3.bf16.msra.mxu0 %v560_v7  ;;  %547 = vmatpush3.bf16.msra.mxu1 %v560_v7 }
  0x3d   :  { %514 = vmatprep.subr.bf16.mxu0 %v561_v8  ;;  %540 = vmatprep.subr.bf16.mxu1 %v561_v8 }
  0x40   :  { %515 = vmatpush3.bf16.msra.mxu0 %v561_v8  ;;  %548 = vmatpush3.bf16.msra.mxu1 %v561_v8 }
  0x41   :  { %516 = vmatprep.subr.bf16.mxu0 %v562_v9  ;;  %541 = vmatprep.subr.bf16.mxu1 %v562_v9 }
  0x44   :  { %517 = vmatpush3.bf16.msra.mxu0 %v562_v9  ;;  %549 = vmatpush3.bf16.msra.mxu1 %v562_v9 }
  0x47   :  { %519 = vmatmul.mubr.bf16.vlgmr.msra.gmra.mrb[0].mxu0 %v565_v10  ;;  %527 = vmatmul.mubr.bf16.vlgmr.msra.gmra.mrb[0].mxu1 %v566_v11 }
  0x48   :  { %522 = vmatprep.mubr.bf16.mxu0 %v567_v12  ;;  %530 = vmatprep.mubr.bf16.mxu1 %v568_v13 }
  0x4f   :  { %523 = vmatmul.mubr.bf16.gmra.mrb[4].mxu0 %v569_v14  ;;  %531 = vmatmul.mubr.bf16.gmra.mrb[4].mxu1 %v570_v15 }
 0x11a   :  { %v520_v17 = vpop.f32.mrb[0].mxu0  ;;  %v528_v18 = vpop.f32.mrb[0].mxu1 }
 0x11b   :  { %v222_v19 = vadd.f32 %v520_v17, %v390_v16  ;;  %v254_v20 = vadd.f32 %v528_v18, %v390_v16  ;;  %v213_v21 = vpop.f32.mrb[1].mxu0  ;;  %v245_v22 = vpop.f32.mrb[1].mxu1 }
 0x11c   :  { %v214_v23 = vadd.f32 %v390_v16, %v213_v21  ;;  %v246_v24 = vadd.f32 %v390_v16, %v245_v22  ;;  %v521_v25 = vpop.f32.mrb[2].mxu0  ;;  %v529_v26 = vpop.f32.mrb[2].mxu1 }
 0x11d   :  { %v225_v27 = vadd.f32 %v521_v25, %v390_v16  ;;  %v257_v28 = vadd.f32 %v529_v26, %v390_v16  ;;  %v216_v29 = vpop.f32.mrb[3].mxu0  ;;  %v248_v30 = vpop.f32.mrb[3].mxu1  ;;  %v278_v33 = vmax.f32 %v222_v19, 0.0  ;;  %v286_v34 = vmax.f32 %v254_v20, 0.0 }
 0x11e   :  { %v217_v31 = vadd.f32 %v390_v16, %v216_v29  ;;  %v249_v32 = vadd.f32 %v390_v16, %v248_v30  ;;  %v276_v37 = vmax.f32 %v214_v23, 0.0  ;;  %v284_v38 = vmax.f32 %v246_v24, 0.0 }
 0x11f   :  { %v279_v35 = vmax.f32 %v225_v27, 0.0  ;;  %v287_v36 = vmax.f32 %v257_v28, 0.0 }
 0x120   :  { %v277_v39 = vmax.f32 %v217_v31, 0.0  ;;  %v285_v40 = vmax.f32 %v249_v32, 0.0 }
 0x121   :  { %v447_v41 = vpack.c.bf16 %v279_v35, %v278_v33  ;;  %v467_v42 = vpack.c.bf16 %v287_v36, %v286_v34 }
 0x122   :  { %v442_v43 = vpack.c.bf16 %v277_v39, %v276_v37  ;;  %v462_v44 = vpack.c.bf16 %v285_v40, %v284_v38  ;;  %v524_v45 = vpop.f32.mrb[4].mxu0  ;;  %v532_v46 = vpop.f32.mrb[4].mxu1 }
 0x123   :  { %479 = vst [vmem:[#allocation7 + $0x8] sm:$0xff] %v447_v41   ;;  %483 = vst [vmem:[#allocation7 + $0x28] sm:$0xff] %v467_v42   ;;  %v238_v47 = vadd.f32 %v524_v45, %v390_v16  ;;  %v270_v48 = vadd.f32 %v532_v46, %v390_v16  ;;  %v229_v49 = vpop.f32.mrb[5].mxu0  ;;  %v261_v50 = vpop.f32.mrb[5].mxu1 }
 0x124   :  { %443 = vst [vmem:[#allocation7] sm:$0xff] %v442_v43   ;;  %482 = vst [vmem:[#allocation7 + $0x20] sm:$0xff] %v462_v44   ;;  %v230_v51 = vadd.f32 %v390_v16, %v229_v49  ;;  %v262_v52 = vadd.f32 %v390_v16, %v261_v50  ;;  %v525_v53 = vpop.f32.mrb[6].mxu0  ;;  %v533_v54 = vpop.f32.mrb[6].mxu1 }
 0x125   :  { %v241_v55 = vadd.f32 %v525_v53, %v390_v16  ;;  %v273_v56 = vadd.f32 %v533_v54, %v390_v16  ;;  %v232_v57 = vpop.f32.mrb[7].mxu0  ;;  %v264_v58 = vpop.f32.mrb[7].mxu1  ;;  %v282_v61 = vmax.f32 %v238_v47, 0.0  ;;  %v290_v62 = vmax.f32 %v270_v48, 0.0 }
 0x126   :  { %v233_v59 = vadd.f32 %v390_v16, %v232_v57  ;;  %v265_v60 = vadd.f32 %v390_v16, %v264_v58  ;;  %v280_v1 = vmax.f32 %v230_v51, 0.0  ;;  %v288_v2 = vmax.f32 %v262_v52, 0.0 }
 0x127   :  { %v283_v63 = vmax.f32 %v241_v55, 0.0  ;;  %v291_v0 = vmax.f32 %v273_v56, 0.0 }
 0x128   :  { %v281_v3 = vmax.f32 %v233_v59, 0.0  ;;  %v289_v4 = vmax.f32 %v265_v60, 0.0 }
 0x129   :  { %v457_v5 = vpack.c.bf16 %v283_v63, %v282_v61  ;;  %v477_v6 = vpack.c.bf16 %v291_v0, %v290_v62 }
 0x12a   :  { %v452_v7 = vpack.c.bf16 %v281_v3, %v280_v1  ;;  %v472_v8 = vpack.c.bf16 %v289_v4, %v288_v2 }
 0x12b   :  { %481 = vst [vmem:[#allocation7 + $0x18] sm:$0xff] %v457_v5   ;;  %485 = vst [vmem:[#allocation7 + $0x38] sm:$0xff] %v477_v6  }
 0x12c   :  { %480 = vst [vmem:[#allocation7 + $0x10] sm:$0xff] %v452_v7   ;;  %484 = vst [vmem:[#allocation7 + $0x30] sm:$0xff] %v472_v8  }
 0x12d   :  { %626 = shalt.err (!%p623_p6)
}
 0x12e   :  { %s627_s15 = scalar_lea.hbm %s719_s3, 1024 }
 0x12f   :  { %p628_p7 = scmp.ne.s32.totalorder %s719_s3, %s627_s15  ;;  %p631_p8 = scmp.lt.u32.totalorder %s627_s15, %s719_s3 }
 0x131   :  { %p633_p9 = pnand %p631_p8, %p628_p7 }
 0x133   :  { %636 = shalt.err (!%p633_p9)
}
 0x134   :  { %383 = dma.vmem_to_hbm [thread:$0]  %s378_s11, 1024, %s719_s3, [#allocation4], %s644_s22, %s644_s22, %s645_s23  }
 0x135   :  { %641 = dma.done.wait [#allocation4], 1024  }
 0x136   :  { %642 = vsyncadd [#allocation4], 4294966272 }
 0x137   :  { %387 = vsyncpa [#allocation3], 1 }
 0x138   :  { %388 = vsyncpa [#allocation6], 1 }
 0x139   :  { %389 = vsyncpa [#allocation4], 1 }

</bundles_post_ra>
